<compile_context>
chip_gen: v7x
topology: tpu7x:2x2x1
jax: 0.10.0
libtpu: 0.0.40
codegen_flags: <defaults>
</compile_context>

<pallas_src>
import functools

import jax
import jax.numpy as jnp
from jax.experimental import pallas as pl
from jax.experimental.pallas import tpu as pltpu

LANE = 128      # vreg lane width
SUBLANE = 8     # vreg sublane width
MAX_TILE = 4096 # keeps streamed x/out buffers + f32 temporaries well inside the
                # smallest scoped-VMEM default (16 MiB v5e, 32 MiB v7x)


def _round_up(x, m):
    return ((x + m - 1) // m) * m


def _pad2(a, rows, cols):
    return jnp.pad(a, ((0, rows - a.shape[0]), (0, cols - a.shape[1])))


def _default_tanh_dtype():
    """bf16 tanh on chips with a bf16 EUP (v6e/v7x); f32 on v5e and earlier."""
    kind = jax.devices()[0].device_kind.lower()
    for old in ("v2", "v3", "v4", "v5"):
        if old in kind:
            return jnp.float32
    return jnp.bfloat16


def fcnn_kernel(x_ref, w1_ref, b1_ref, w2_ref, b2_ref, w3_ref, b3_ref, o_ref,
                *, tanh_dtype):
    """One batch tile: (TILE_B, in_dim) bf16 -> (TILE_B, OUT_PAD=8) f32.
    MXU matmuls use bf16 operands with f32 accumulation; bias adds are f32;
    tanh runs in `tanh_dtype` (bf16 on v6e/v7x, f32 on v5e)."""
    # layer 1: Linear + Tanh
    h = jnp.dot(x_ref[...], w1_ref[...],
                preferred_element_type=jnp.float32) + b1_ref[...]
    h = jnp.tanh(h.astype(tanh_dtype)).astype(w2_ref.dtype)
    # layer 2: Linear + Tanh
    h = jnp.dot(h, w2_ref[...],
                preferred_element_type=jnp.float32) + b2_ref[...]
    h = jnp.tanh(h.astype(tanh_dtype)).astype(w3_ref.dtype)
    # layer 3: Linear (no activation)
    out = jnp.dot(h, w3_ref[...],
                  preferred_element_type=jnp.float32) + b3_ref[...]
    o_ref[...] = out.astype(o_ref.dtype)   # (TILE_B, 8) masked store, tiny


def fcnn_forward(x, params, *, tile_b=2048, mxu_dtype=jnp.bfloat16,
                 tanh_dtype=None):
    """x: [B, in_dim] float32.  params: transposed f32 weights + biases
    (w*: [in_features, out_features], b*: [1, out_features]).  Returns f32
    [B, out_dim]."""
    if tanh_dtype is None:
        tanh_dtype = _default_tanh_dtype()

    w1, b1, w2, b2, w3, b3 = (params["w1"], params["b1"], params["w2"],
                              params["b2"], params["w3"], params["b3"])
    B, in_dim = x.shape
    hidden = w1.shape[1]
    out_dim = w3.shape[1]

    # Hidden padded to the 128-lane width (lane-dense VPU/EUP/MXU work); the
    # output is padded only to 8 so the HBM writeback stays small.
    H = _round_up(hidden, LANE)
    O = _round_up(out_dim, SUBLANE)

    # Batch tiling: pad B to a multiple of the tile, stream tiles over a 1-D grid.
    B_pad = _round_up(B, SUBLANE)
    tile = max(SUBLANE, min(_round_up(tile_b, SUBLANE), B_pad, MAX_TILE))
    # Keep >= 2 grid steps when possible so the "parallel" axis actually splits
    # across v7x's two TensorCores.
    if B_pad >= 2 * SUBLANE and tile >= B_pad:
        tile = _round_up(-(-B_pad // 2), SUBLANE)
    B_pad = _round_up(B_pad, tile)
    grid = (B_pad // tile,)

    # Pre-cast the streamed activations to bf16 (half the input DMA bytes).
    x_p = jnp.pad(x, ((0, B_pad - B), (0, 0))).astype(mxu_dtype)

    # Zero-pad weights/biases; weights pre-cast to bf16 once (they stay
    # VMEM-resident across the whole grid via constant index_maps).
    w1_p = _pad2(w1, in_dim, H).astype(mxu_dtype)
    w2_p = _pad2(w2, H, H).astype(mxu_dtype)
    w3_p = _pad2(w3, H, O).astype(mxu_dtype)
    b1_p = _pad2(b1, 1, H)   # biases stay f32 (f32 add on every chip gen)
    b2_p = _pad2(b2, 1, H)
    b3_p = _pad2(b3, 1, O)

    cost = pl.CostEstimate(
        flops=2 * B_pad * (in_dim * H + H * H + H * O),
        transcendentals=2 * B_pad * H,
        bytes_accessed=(x_p.size * x_p.dtype.itemsize
                        + (w1_p.size + w2_p.size + w3_p.size) * w1_p.dtype.itemsize
                        + (b1_p.size + b2_p.size + b3_p.size) * 4
                        + B_pad * O * 4),
    )

    # Constant index_map -> block is revisited every step and kept VMEM-resident.
    resident = lambda a: pl.BlockSpec(a.shape, lambda i: (0,) * a.ndim)

    out_p = pl.pallas_call(
        functools.partial(fcnn_kernel, tanh_dtype=tanh_dtype),
        out_shape=jax.ShapeDtypeStruct((B_pad, O), jnp.float32),
        grid=grid,
        in_specs=[
            pl.BlockSpec((tile, in_dim), lambda i: (i, 0)),   # streamed activations
            resident(w1_p), resident(b1_p),
            resident(w2_p), resident(b2_p),
            resident(w3_p), resident(b3_p),
        ],
        out_specs=pl.BlockSpec((tile, O), lambda i: (i, 0)),  # narrow (8-lane) writeback
        compiler_params=pltpu.CompilerParams(
            dimension_semantics=("parallel",),   # batch axis -> megacore on v7x
        ),
        cost_estimate=cost,
    )(x_p, w1_p, b1_p, w2_p, b2_p, w3_p, b3_p)

    # Strip batch / lane padding outside the kernel.
    return out_p[:B, :out_dim]


def init_params(key, in_dim, out_dim, hidden_dim):
    """PyTorch nn.Linear default init (uniform +-1/sqrt(fan_in)); weights stored
    transposed as [in_features, out_features], biases as [1, out_features]."""
    def linear(k, fan_in, fan_out):
        kw, kb = jax.random.split(k)
        bound = 1.0 / jnp.sqrt(fan_in)
        w = jax.random.uniform(kw, (fan_in, fan_out), jnp.float32, -bound, bound)
        b = jax.random.uniform(kb, (1, fan_out), jnp.float32, -bound, bound)
        return w, b

    k1, k2, k3 = jax.random.split(key, 3)
    w1, b1 = linear(k1, in_dim, hidden_dim)
    w2, b2 = linear(k2, hidden_dim, hidden_dim)
    w3, b3 = linear(k3, hidden_dim, out_dim)
    return {"w1": w1, "b1": b1, "w2": w2, "b2": b2, "w3": w3, "b3": b3}


def fcnn_reference_f32(x, p):
    h1 = jnp.tanh(x @ p["w1"] + p["b1"])
    h2 = jnp.tanh(h1 @ p["w2"] + p["b2"])
    return h2 @ p["w3"] + p["b3"]


def fcnn_reference_matched(x, p, *, mxu_dtype=jnp.bfloat16, tanh_dtype=jnp.float32):
    """Same bf16-operand / f32-accumulate / tanh-dtype recipe as the kernel."""
    c = lambda a: a.astype(mxu_dtype)
    h = jnp.dot(c(x), c(p["w1"]), preferred_element_type=jnp.float32) + p["b1"]
    h = jnp.tanh(h.astype(tanh_dtype)).astype(mxu_dtype)
    h = jnp.dot(h, c(p["w2"]), preferred_element_type=jnp.float32) + p["b2"]
    h = jnp.tanh(h.astype(tanh_dtype)).astype(mxu_dtype)
    return jnp.dot(h, c(p["w3"]), preferred_element_type=jnp.float32) + p["b3"]


if __name__ == "__main__":
    key = jax.random.PRNGKey(0)
    kx1, kp, kx2, kx3 = jax.random.split(key, 4)

    in_dim, hidden_dim, out_dim = 4, 32, 2
    params = init_params(kp, in_dim, out_dim, hidden_dim)
    tanh_dtype = _default_tanh_dtype()

    def check(x, y):
        ref_m = fcnn_reference_matched(x, params, tanh_dtype=tanh_dtype)
        ref_f = fcnn_reference_f32(x, params)
        assert y.shape == ref_f.shape
        # Tight-ish against the matched (bf16-operand, same-tanh-dtype) reference,
        # loose against the pure-f32 reference.
        assert jnp.allclose(y, ref_m, atol=2.5e-2, rtol=2.5e-2), \
            float(jnp.max(jnp.abs(y - ref_m)))
        assert jnp.allclose(y, ref_f, atol=6e-2, rtol=6e-2), \
            float(jnp.max(jnp.abs(y - ref_f)))

    # Case 1: tiny batch (single tile, grid of 1).
    x1 = jax.random.normal(kx1, (8, in_dim), jnp.float32)
    y1 = fcnn_forward(x1, params, tanh_dtype=tanh_dtype)
    jax.block_until_ready(y1)
    check(x1, y1)

    # Case 2: batch not a multiple of the tile -> exercises the batch grid,
    # row padding and the post-call slice (3 grid steps over 48 padded rows).
    x2 = jax.random.normal(kx2, (40, in_dim), jnp.float32)
    y2 = fcnn_forward(x2, params, tile_b=16, tanh_dtype=tanh_dtype)
    jax.block_until_ready(y2)
    check(x2, y2)

    # Case 3: default tile with B smaller than the tile -> exercises the
    # ">= 2 grid steps for megacore" split path (grid of 2).
    x3 = jax.random.normal(kx3, (100, in_dim), jnp.float32)
    y3 = fcnn_forward(x3, params, tanh_dtype=tanh_dtype)
    jax.block_until_ready(y3)
    check(x3, y3)

    print("KERNEL_OK")
</pallas_src>

<mosaic_0001>
module attributes {stable_mosaic.version = 11 : i64} {
  func.func @fcnn_kernel(%arg0: i32, %arg1: memref<8x4xbf16, #tpu.memory_space<vmem>>, %arg2: memref<4x128xbf16, #tpu.memory_space<vmem>>, %arg3: memref<1x128xf32, #tpu.memory_space<vmem>>, %arg4: memref<128x128xbf16, #tpu.memory_space<vmem>>, %arg5: memref<1x128xf32, #tpu.memory_space<vmem>>, %arg6: memref<128x8xbf16, #tpu.memory_space<vmem>>, %arg7: memref<1x8xf32, #tpu.memory_space<vmem>>, %arg8: memref<8x8xf32, #tpu.memory_space<vmem>>) attributes {dimension_semantics = [#tpu.dimension_semantics<parallel>], iteration_bounds = array<i64: 1>, scalar_prefetch = 0 : i64, scratch_operands = 0 : i64, tpu.core_type = #tpu.core_type<tc>, window_params = [{transform_indices = @transform_0, window_bounds = array<i64: 8, 4>}, {pipeline_mode = #tpu.pipeline_mode<synchronous>, transform_indices = @transform_1, window_bounds = array<i64: 4, 128>}, {pipeline_mode = #tpu.pipeline_mode<synchronous>, transform_indices = @transform_2, window_bounds = array<i64: 1, 128>}, {pipeline_mode = #tpu.pipeline_mode<synchronous>, transform_indices = @transform_3, window_bounds = array<i64: 128, 128>}, {pipeline_mode = #tpu.pipeline_mode<synchronous>, transform_indices = @transform_4, window_bounds = array<i64: 1, 128>}, {pipeline_mode = #tpu.pipeline_mode<synchronous>, transform_indices = @transform_5, window_bounds = array<i64: 128, 8>}, {pipeline_mode = #tpu.pipeline_mode<synchronous>, transform_indices = @transform_6, window_bounds = array<i64: 1, 8>}, {transform_indices = @transform_7, window_bounds = array<i64: 8, 8>}]} {
    %c0 = arith.constant 0 : index
    %c0_0 = arith.constant 0 : index
    %0 = vector.load %arg1[%c0, %c0_0] : memref<8x4xbf16, #tpu.memory_space<vmem>>, vector<8x4xbf16>
    %c0_1 = arith.constant 0 : index
    %c0_2 = arith.constant 0 : index
    %1 = vector.load %arg2[%c0_1, %c0_2] : memref<4x128xbf16, #tpu.memory_space<vmem>>, vector<4x128xbf16>
    %cst = arith.constant dense<0.000000e+00> : vector<8x128xf32>
    %2 = tpu.matmul %0, %1, %cst {dimension_numbers = #tpu.dot_dimension_numbers<[1], [0], [0], [1], [0, 0, 1, 1], [], []>} : vector<8x4xbf16>, vector<4x128xbf16>, vector<8x128xf32> -> vector<8x128xf32>
    %c0_3 = arith.constant 0 : index
    %c0_4 = arith.constant 0 : index
    %3 = vector.load %arg3[%c0_3, %c0_4] : memref<1x128xf32, #tpu.memory_space<vmem>>, vector<1x128xf32>
    %4 = vector.broadcast %3 : vector<1x128xf32> to vector<8x128xf32>
    %5 = arith.addf %2, %4 : vector<8x128xf32>
    %6 = arith.truncf %5 : vector<8x128xf32> to vector<8x128xbf16>
    %7 = math.tanh %6 : vector<8x128xbf16>
    %c0_5 = arith.constant 0 : index
    %c0_6 = arith.constant 0 : index
    %8 = vector.load %arg4[%c0_5, %c0_6] : memref<128x128xbf16, #tpu.memory_space<vmem>>, vector<128x128xbf16>
    %cst_7 = arith.constant dense<0.000000e+00> : vector<8x128xf32>
    %9 = tpu.matmul %7, %8, %cst_7 {dimension_numbers = #tpu.dot_dimension_numbers<[1], [0], [0], [1], [0, 0, 1, 1], [], []>} : vector<8x128xbf16>, vector<128x128xbf16>, vector<8x128xf32> -> vector<8x128xf32>
    %c0_8 = arith.constant 0 : index
    %c0_9 = arith.constant 0 : index
    %10 = vector.load %arg5[%c0_8, %c0_9] : memref<1x128xf32, #tpu.memory_space<vmem>>, vector<1x128xf32>
    %11 = vector.broadcast %10 : vector<1x128xf32> to vector<8x128xf32>
    %12 = arith.addf %9, %11 : vector<8x128xf32>
    %13 = arith.truncf %12 : vector<8x128xf32> to vector<8x128xbf16>
    %14 = math.tanh %13 : vector<8x128xbf16>
    %c0_10 = arith.constant 0 : index
    %c0_11 = arith.constant 0 : index
    %15 = vector.load %arg6[%c0_10, %c0_11] : memref<128x8xbf16, #tpu.memory_space<vmem>>, vector<128x8xbf16>
    %cst_12 = arith.constant dense<0.000000e+00> : vector<8x8xf32>
    %16 = tpu.matmul %14, %15, %cst_12 {dimension_numbers = #tpu.dot_dimension_numbers<[1], [0], [0], [1], [0, 0, 1, 1], [], []>} : vector<8x128xbf16>, vector<128x8xbf16>, vector<8x8xf32> -> vector<8x8xf32>
    %c0_13 = arith.constant 0 : index
    %c0_14 = arith.constant 0 : index
    %17 = vector.load %arg7[%c0_13, %c0_14] : memref<1x8xf32, #tpu.memory_space<vmem>>, vector<1x8xf32>
    %18 = vector.broadcast %17 : vector<1x8xf32> to vector<8x8xf32>
    %19 = arith.addf %16, %18 : vector<8x8xf32>
    %c0_15 = arith.constant 0 : index
    %c0_16 = arith.constant 0 : index
    %20 = vector.load %arg8[%c0_15, %c0_16] : memref<8x8xf32, #tpu.memory_space<vmem>>, vector<8x8xf32>
    tpu.vector_store %arg8[%c0_15, %c0_16], %19 {strides = array<i32>} : memref<8x8xf32, #tpu.memory_space<vmem>>, vector<8x8xf32>,
    return
  }
  func.func @transform_0(%arg0: i32) -> (i32, i32) {
    %c0_i32 = arith.constant 0 : i32
    %c0_i32_0 = arith.constant 0 : i32
    return %arg0, %c0_i32 : i32, i32
  }
  func.func @transform_1(%arg0: i32) -> (i32, i32) {
    %c0_i32 = arith.constant 0 : i32
    %c0_i32_0 = arith.constant 0 : i32
    %c0_i32_1 = arith.constant 0 : i32
    return %c0_i32, %c0_i32_0 : i32, i32
  }
  func.func @transform_2(%arg0: i32) -> (i32, i32) {
    %c0_i32 = arith.constant 0 : i32
    %c0_i32_0 = arith.constant 0 : i32
    %c0_i32_1 = arith.constant 0 : i32
    return %c0_i32, %c0_i32_0 : i32, i32
  }
  func.func @transform_3(%arg0: i32) -> (i32, i32) {
    %c0_i32 = arith.constant 0 : i32
    %c0_i32_0 = arith.constant 0 : i32
    %c0_i32_1 = arith.constant 0 : i32
    return %c0_i32, %c0_i32_0 : i32, i32
  }
  func.func @transform_4(%arg0: i32) -> (i32, i32) {
    %c0_i32 = arith.constant 0 : i32
    %c0_i32_0 = arith.constant 0 : i32
    %c0_i32_1 = arith.constant 0 : i32
    return %c0_i32, %c0_i32_0 : i32, i32
  }
  func.func @transform_5(%arg0: i32) -> (i32, i32) {
    %c0_i32 = arith.constant 0 : i32
    %c0_i32_0 = arith.constant 0 : i32
    %c0_i32_1 = arith.constant 0 : i32
    return %c0_i32, %c0_i32_0 : i32, i32
  }
  func.func @transform_6(%arg0: i32) -> (i32, i32) {
    %c0_i32 = arith.constant 0 : i32
    %c0_i32_0 = arith.constant 0 : i32
    %c0_i32_1 = arith.constant 0 : i32
    return %c0_i32, %c0_i32_0 : i32, i32
  }
  func.func @transform_7(%arg0: i32) -> (i32, i32) {
    %c0_i32 = arith.constant 0 : i32
    %c0_i32_0 = arith.constant 0 : i32
    return %arg0, %c0_i32 : i32, i32
  }
}

</mosaic_0001>

<bundles_post_ra>
// kernel: tpu_custom_call.1
= control target key start
LH: loop header
LB: loop body
LE: loop exit
PB: predicated region body
PF: predicated region fallthrough
CT: control target
= control target key end

     0   :  { %vm41_vm0 = vcmask 1041408   ;;  %vm37_vm1 = vcmask 31744   ;;  %v460_v1 = vmov 0.0   ;;  %vm461_vm2 = vmmov 0   ;;  %s598_s0 = inlined_call_operand.vmem [shape: bf16[8,4], index: 0, kind: input, shape index: {}]   ;;  %s599_s1 = inlined_call_operand.vmem [shape: bf16[4,128], index: 1, kind: input, shape index: {}]   ;;  %s600_s2 = inlined_call_operand.vmem [shape: f32[1,128], index: 2, kind: input, shape index: {}]   ;;  %s601_s3 = inlined_call_operand.vmem [shape: bf16[128,128], index: 3, kind: input, shape index: {}]   ;;  %s602_s4 = inlined_call_operand.vmem [shape: f32[1,128], index: 4, kind: input, shape index: {}]   ;;  %s603_s5 = inlined_call_operand.vmem [shape: bf16[128,8], index: 5, kind: input, shape index: {}]   ;;  %s604_s6 = inlined_call_operand.vmem [shape: f32[1,8], index: 6, kind: input, shape index: {}]   ;;  %s605_s7 = inlined_call_operand.hbm [shape: f32[8,8], index: 7, kind: output, shape index: {}]  }
   0x1   :  { %v29_v0 = vld [vmem:[%s599_s1] sm:$0x3]  ;;  %367 = vmatprep.subr.bf16.mxu0 %v460_v1  ;;  %369 = vmatprep.mubr.msk.bf16.mxu0 %vm461_vm2, %v460_v1  ;;  %v417_v5 = vld [vmem:[%s601_s3 + $0x8] sm:$0xff]   ;;  %v418_v6 = vld [vmem:[%s601_s3 + $0x10] sm:$0xff]  }
   0x2   :  { %v43_v2 = vsel %vm41_vm0, %v29_v0, 0  ;;  %v28_v3 = vld [vmem:[%s598_s0] sm:$0xf]  ;;  %373 = vmatprep.subr.bf16.mxu1 %v460_v1  ;;  %389 = vmatprep.mubr.msk.bf16.mxu1 %vm461_vm2, %v460_v1  ;;  %v419_v7 = vld [vmem:[%s601_s3 + $0x18] sm:$0xff]  }
   0x3   :  { %v416_v4 = vld [vmem:[%s601_s3] sm:$0xff]   ;;  %368 = vmatpush3.bf16.msra.mxu0 %v43_v2 }
   0x4   :  { %374 = vmatpush3.bf16.msra.mxu1 %v416_v4  ;;  %393 = vmatprep.subr.bf16.mxu0 %v460_v1 }
   0x5   :  { %375 = vmatprep.subr.bf16.mxu1 %v460_v1 }
   0x6   :  { %370 = vmatmul.mubr.msk.bf16.vlgmr.msra.gmra.mrb[0].mxu0 %vm37_vm1, %v28_v3 }
   0x7   :  { %409 = vmatprep.mubr.msk.bf16.mxu0 %vm461_vm2, %v460_v1 }
   0x8   :  { %376 = vmatpush3.bf16.msra.mxu1 %v417_v5 }
   0x9   :  { %377 = vmatprep.subr.bf16.mxu1 %v460_v1 }
   0xc   :  { %378 = vmatpush3.bf16.msra.mxu1 %v418_v6 }
   0xd   :  { %379 = vmatprep.subr.bf16.mxu1 %v460_v1 }
   0xe   :  { %12 = vsyncpa [#allocation3], 0  ;;  %v420_v8 = vld [vmem:[%s601_s3 + $0x20] sm:$0xff]   ;;  %v421_v9 = vld [vmem:[%s601_s3 + $0x28] sm:$0xff]   ;;  %vm311_vm3 = vcmask 64512  }
   0xf   :  { %v422_v10 = vld [vmem:[%s601_s3 + $0x30] sm:$0xff]   ;;  %v423_v11 = vld [vmem:[%s601_s3 + $0x38] sm:$0xff]   ;;  %v424_v12 = vld [vmem:[%s603_s5] sm:$0xff]  }
  0x10   :  { %380 = vmatpush3.bf16.msra.mxu1 %v419_v7  ;;  %394 = vmatpush3.bf16.msra.mxu0 %v424_v12  ;;  %v425_v13 = vld [vmem:[%s603_s5 + $0x8] sm:$0xff]   ;;  %v426_v14 = vld [vmem:[%s603_s5 + $0x10] sm:$0xff]   ;;  %v427_v15 = vld [vmem:[%s603_s5 + $0x18] sm:$0xff]  }
  0x11   :  { %381 = vmatprep.subr.bf16.mxu1 %v460_v1  ;;  %395 = vmatprep.subr.bf16.mxu0 %v460_v1  ;;  %v327_v16 = vld [vmem:[%s600_s2] ss:$0 sm:$0xff]  ;;  %v429_v25 = vld [vmem:[%s603_s5 + $0x28] sm:$0xff]   ;;  %v430_v26 = vld [vmem:[%s603_s5 + $0x30] sm:$0xff]  }
  0x12   :  { %v428_v24 = vld [vmem:[%s603_s5 + $0x20] sm:$0xff]   ;;  %v431_v27 = vld [vmem:[%s603_s5 + $0x38] sm:$0xff]   ;;  %s462_s5 = smov [#allocation2]  }
  0x13   :  { %v329_v28 = vld [vmem:[%s602_s4] ss:$0 sm:$0xff]  ;;  %s319_s14 = sshll.u32 %s462_s5, 4  ;;  %s320_s14 = int_to_ptr.vmem [resolvable:$true] %s319_s14 }
  0x14   :  { %382 = vmatpush3.bf16.msra.mxu1 %v420_v8  ;;  %396 = vmatpush3.bf16.msra.mxu0 %v425_v13  ;;  %v338_v36 = vld [vmem:[%s604_s6] ss:$0 sm:$0xff]  ;;  %s436_s4 = scalar_lea.vmem %s320_s14, 128  ;;  %p441_p1 = scmp.lt.s32.totalorder %s320_s14, %s320_s14 }
  0x15   :  { %383 = vmatprep.subr.bf16.mxu1 %v460_v1  ;;  %397 = vmatprep.subr.bf16.mxu0 %v460_v1  ;;  %p437_p0 = scmp.ne.s32.totalorder %s320_s14, %s436_s4  ;;  %p442_p2 = scmp.lt.s32.totalorder %s436_s4, %s436_s4 }
  0x17   :  { %p443_p3 = por %p442_p2, %p441_p1 }
  0x18   :  { %384 = vmatpush3.bf16.msra.mxu1 %v421_v9  ;;  %398 = vmatpush3.bf16.msra.mxu0 %v426_v14 }
  0x19   :  { %385 = vmatprep.subr.bf16.mxu1 %v460_v1  ;;  %399 = vmatprep.subr.bf16.mxu0 %v460_v1  ;;  %p444_p4 = pnand %p443_p3, %p437_p0 }
  0x1c   :  { %386 = vmatpush3.bf16.msra.mxu1 %v422_v10  ;;  %400 = vmatpush3.bf16.msra.mxu0 %v427_v15 }
  0x1d   :  { %387 = vmatprep.subr.bf16.mxu1 %v460_v1  ;;  %401 = vmatprep.subr.bf16.mxu0 %v460_v1 }
  0x20   :  { %388 = vmatpush3.bf16.msra.mxu1 %v423_v11  ;;  %402 = vmatpush3.bf16.msra.mxu0 %v428_v24 }
  0x21   :  { %403 = vmatprep.subr.bf16.mxu0 %v460_v1 }
  0x24   :  { %404 = vmatpush3.bf16.msra.mxu0 %v429_v25 }
  0x25   :  { %405 = vmatprep.subr.bf16.mxu0 %v460_v1 }
  0x28   :  { %406 = vmatpush3.bf16.msra.mxu0 %v430_v26 }
  0x29   :  { %407 = vmatprep.subr.bf16.mxu0 %v460_v1 }
  0x2c   :  { %408 = vmatpush3.bf16.msra.mxu0 %v431_v27 }
  0xd9   :  { %v79_v17 = vpop.f32.mrb[0].mxu0 }
  0xda   :  { %v80_v18 = vadd.f32 %v327_v16, %v79_v17  ;;  %v371_v19 = vpop.f32.mrb[1].mxu0 }
  0xdb   :  { %v82_v20 = vpop.f32.mrb[2].mxu0 }
  0xdc   :  { %v85_v21 = vpack.c.bf16 %v80_v18, %v80_v18  ;;  %v372_v22 = vpop.f32.mrb[3].mxu0 }
  0xde   :  { %432 = vtanh.bf16 %v85_v21 }
  0xe9   :  { %v433_v23 = vpop.eup %432 }
  0xea   :  { %390 = vmatmul.mubr.bf16.vlgmr.msra.gmra.mrb[0].mxu1 %v433_v23 }
 0x1bd   :  { %v192_v29 = vpop.f32.mrb[0].mxu1 }
 0x1be   :  { %v193_v30 = vadd.f32 %v329_v28, %v192_v29  ;;  %v391_v31 = vpop.f32.mrb[1].mxu1 }
 0x1bf   :  { %v195_v32 = vpop.f32.mrb[2].mxu1 }
 0x1c0   :  { %v198_v33 = vpack.c.bf16 %v193_v30, %v193_v30  ;;  %v392_v34 = vpop.f32.mrb[3].mxu1 }
 0x1c2   :  { %434 = vtanh.bf16 %v198_v33 }
 0x1cd   :  { %v435_v35 = vpop.eup %434 }
 0x1ce   :  { %410 = vmatmul.mubr.bf16.vlgmr.msra.gmra.mrb[4].mxu0 %v435_v35 }
 0x2a1   :  { %v305_v37 = vpop.f32.mrb[4].mxu0 }
 0x2a2   :  { %v306_v38 = vadd.f32 %v338_v36, %v305_v37  ;;  %v411_v39 = vpop.f32.mrb[5].mxu0 }
 0x2a3   :  { %v308_v40 = vpop.f32.mrb[6].mxu0 }
 0x2a4   :  { %v412_v41 = vpop.f32.mrb[7].mxu0  ;;  %312 = vst.msk [vmem:[#allocation2] sm:$0xff] %vm311_vm3, %v306_v38 }
 0x2a5   :  { %447 = shalt.err (!%p444_p4)
}
 0x2a6   :  { %s448_s6 = scalar_lea.hbm %s605_s7, 128 }
 0x2a7   :  { %p449_p5 = scmp.ne.s32.totalorder %s605_s7, %s448_s6  ;;  %p452_p6 = scmp.lt.u32.totalorder %s448_s6, %s605_s7 }
 0x2a9   :  { %p454_p7 = pnand %p452_p6, %p449_p5 }
 0x2ab   :  { %457 = shalt.err (!%p454_p7)
}
 0x2ac   :  { %322 = dma.vmem_to_hbm [thread:$0]  %s320_s14, 128, %s605_s7, [#allocation3]  }
 0x2ad   :  { %458 = dma.done.wait [#allocation3], 128  }
 0x2ae   :  { %459 = vsyncadd [#allocation3], 4294967168 }
 0x2af   :  { %326 = vsyncpa [#allocation3], 1 }

</bundles_post_ra>
